<compile_context>
chip_gen: v7x
topology: tpu7x:2x2x1
jax: 0.10.0
libtpu: 0.0.40
codegen_flags: <defaults>
</compile_context>

<pallas_src>
from typing import NamedTuple

import jax
import jax.numpy as jnp
from jax.experimental import pallas as pl
from jax.experimental.pallas import tpu as pltpu


def _round_up(x, m):
    return ((x + m - 1) // m) * m


class LinearPlan(NamedTuple):
    B: int
    IN: int
    OUT: int
    B_p: int
    IN_p: int
    OUT_p: int
    tm: int
    tn: int
    tk: int
    vmem_limit_bytes: int


# Double-buffered VMEM footprint target: comfortably inside every generation's
# scoped limit once vmem_limit_bytes is raised to 32 MiB (v5e default is 16).
_VMEM_BUDGET_BYTES = 18 * 1024 * 1024


def plan_linear_tiles(B, IN, OUT, dtype_bytes=4, budget_bytes=_VMEM_BUDGET_BYTES):
    """Pick (tm, tn, tk) for y = x @ W.T + b.

    The Linear forward is weight-bandwidth bound at modest batch sizes, so the
    plan maximizes weight reuse: tm spans the whole padded batch when it fits
    (weight streamed from HBM exactly once), and tn/tk are grown toward 1024
    under the VMEM budget for lane-dense DMAs and few grid steps.
    """
    B_a = _round_up(B, 8)       # f32 sublane alignment
    IN_a = _round_up(IN, 128)   # lane alignment
    OUT_a = _round_up(OUT, 128)

    # M tile: single block for small-batch inference; otherwise 512
    # (256-aligned for the v6e/v7x 256-wide MXU).
    tm = B_a if B_a <= 512 else 512

    # K tile: one block if IN fits in a 1024-wide tile, else the 128-aligned
    # candidate minimizing dead (all-zero) K padding.
    if IN_a <= 1024:
        tk = IN_a
    else:
        best_key, tk = None, 1024
        for cand in (1024, 896, 768, 640, 512, 384, 256):
            waste = _round_up(IN_a, cand) - IN_a
            key = (waste, -cand)
            if best_key is None or key < best_key:
                best_key, tk = key, cand

    # N tile: as wide as the budget allows (one weight column slab per step).
    tn = min(OUT_a, 1024)

    def footprint(tm_, tn_, tk_):
        w = 2 * tk_ * tn_ * dtype_bytes   # double-buffered weight tile
        x = 2 * tm_ * tk_ * dtype_bytes   # double-buffered x tile
        o = 2 * tm_ * tn_ * dtype_bytes   # double-buffered output tile
        acc = tm_ * tn_ * 4               # f32 accumulator scratch
        b = 2 * tn_ * dtype_bytes         # bias tile
        return w + x + o + acc + b

    while footprint(tm, tn, tk) > budget_bytes and tn > 256:
        tn //= 2
    while footprint(tm, tn, tk) > budget_bytes and tk > 256:
        tk //= 2
    while footprint(tm, tn, tk) > budget_bytes and tm > 256:
        tm //= 2

    B_p = _round_up(B_a, tm)
    IN_p = _round_up(IN_a, tk)
    OUT_p = _round_up(OUT_a, tn)

    # v7x megacore: guarantee >= 2 blocks on a "parallel" axis when possible so
    # both TensorCores get work (splitting N does not add weight HBM traffic).
    if B_p // tm == 1 and OUT_p // tn == 1 and tn >= 256 and (tn // 2) % 128 == 0:
        tn //= 2

    vmem_limit = max(32 * 1024 * 1024, footprint(tm, tn, tk) + (4 << 20))
    return LinearPlan(B, IN, OUT, B_p, IN_p, OUT_p, tm, tn, tk, vmem_limit)


def prepare_linear_params(weight, bias, plan):
    """One-time layout prep (hoisted out of the per-call hot path).

    Transposes the PyTorch [OUT, IN] weight to [IN, OUT] and zero-pads both
    operands to the tile grid, so the kernel never transposes a VMEM tile and
    every MXU operand / output store is lane-dense.
    """
    OUT, IN = weight.shape
    assert (IN, OUT) == (plan.IN, plan.OUT)
    w_t = weight.T  # [IN, OUT]
    if (plan.IN_p, plan.OUT_p) != (IN, OUT):
        w_t = jnp.pad(w_t, ((0, plan.IN_p - IN), (0, plan.OUT_p - OUT)))
    b = bias
    if plan.OUT_p != OUT:
        b = jnp.pad(b, (0, plan.OUT_p - OUT))
    return w_t, b.reshape(1, plan.OUT_p)


def _linear_kernel(x_ref, w_ref, b_ref, o_ref, acc_ref):
    # x_ref: [tm, tk], w_ref: [tk, tn], b_ref: [1, tn], o_ref: [tm, tn]
    k = pl.program_id(2)

    @pl.when(k == 0)
    def _():
        # Fold the bias into the accumulator init (one broadcast per output
        # block, no epilogue read-modify-write).
        acc_ref[...] = jnp.broadcast_to(
            b_ref[...].astype(jnp.float32), acc_ref.shape
        )

    acc_ref[...] += jnp.dot(
        x_ref[...], w_ref[...], preferred_element_type=jnp.float32
    )

    @pl.when(k == pl.num_programs(2) - 1)
    def _():
        o_ref[...] = acc_ref[...].astype(o_ref.dtype)


def linear_forward_padded(x, w_padded, b_padded, plan):
    """y = x @ W.T + b with pre-transposed, pre-padded weight/bias."""
    B, IN = x.shape
    assert (B, IN) == (plan.B, plan.IN)
    if (plan.B_p, plan.IN_p) != (B, IN):
        x = jnp.pad(x, ((0, plan.B_p - B), (0, plan.IN_p - IN)))

    grid = (plan.B_p // plan.tm, plan.OUT_p // plan.tn, plan.IN_p // plan.tk)

    cost = pl.CostEstimate(
        flops=2 * plan.B_p * plan.IN_p * plan.OUT_p,
        transcendentals=0,
        bytes_accessed=4 * (plan.B_p * plan.IN_p + plan.IN_p * plan.OUT_p
                            + plan.OUT_p + plan.B_p * plan.OUT_p),
    )

    out_p = pl.pallas_call(
        _linear_kernel,
        out_shape=jax.ShapeDtypeStruct((plan.B_p, plan.OUT_p), x.dtype),
        grid_spec=pltpu.PrefetchScalarGridSpec(
            num_scalar_prefetch=0,
            grid=grid,
            in_specs=[
                pl.BlockSpec((plan.tm, plan.tk), lambda i, j, k: (i, k)),
                pl.BlockSpec((plan.tk, plan.tn), lambda i, j, k: (k, j)),
                pl.BlockSpec((1, plan.tn), lambda i, j, k: (0, j)),
            ],
            out_specs=pl.BlockSpec((plan.tm, plan.tn), lambda i, j, k: (i, j)),
            scratch_shapes=[pltpu.VMEM((plan.tm, plan.tn), jnp.float32)],
        ),
        compiler_params=pltpu.CompilerParams(
            dimension_semantics=("parallel", "parallel", "arbitrary"),
            vmem_limit_bytes=plan.vmem_limit_bytes,
        ),
        cost_estimate=cost,
    )(x, w_padded, b_padded)

    if (plan.B_p, plan.OUT_p) != (plan.B, plan.OUT):
        out_p = out_p[:plan.B, :plan.OUT]
    return out_p


def linear_forward(x, weight, bias):
    """Convenience one-shot wrapper (prep + kernel). Prefer the split path
    (plan_linear_tiles / prepare_linear_params once, then linear_forward_padded
    per call) in a real serving loop."""
    B, IN = x.shape
    OUT, _ = weight.shape
    plan = plan_linear_tiles(B, IN, OUT)
    w_p, b_p = prepare_linear_params(weight, bias, plan)
    return linear_forward_padded(x, w_p, b_p, plan)


if __name__ == "__main__":
    # Small, module-consistent shapes (overhead-dominated at this size; the
    # tiling plan is written for production shapes but stays correct here).
    batch, input_dim, output_dim = 8, 32, 16

    key = jax.random.PRNGKey(0)
    kx, kw, kb = jax.random.split(key, 3)

    x = jax.random.normal(kx, (batch, input_dim), dtype=jnp.float32)
    bound = 1.0 / (input_dim ** 0.5)
    weight = jax.random.uniform(
        kw, (output_dim, input_dim), dtype=jnp.float32, minval=-bound, maxval=bound
    )
    bias = jax.random.uniform(
        kb, (output_dim,), dtype=jnp.float32, minval=-bound, maxval=bound
    )

    # One-time layout prep (outside the per-call hot path), then the kernel.
    plan = plan_linear_tiles(batch, input_dim, output_dim)
    w_p, b_p = prepare_linear_params(weight, bias, plan)
    y = linear_forward_padded(x, w_p, b_p, plan)
    jax.block_until_ready(y)

    # Correctness check against plain-JAX reference.
    y_ref = x @ weight.T + bias
    assert y.shape == (batch, output_dim)
    assert jnp.allclose(y, y_ref, atol=1e-5, rtol=1e-5)

    print("KERNEL_OK")
</pallas_src>

<mosaic_0001>
module attributes {stable_mosaic.version = 11 : i64} {
  func.func @_linear_kernel(%arg0: i32, %arg1: i32, %arg2: i32, %arg3: memref<8x128xf32, #tpu.memory_space<vmem>>, %arg4: memref<128x128xf32, #tpu.memory_space<vmem>>, %arg5: memref<1x128xf32, #tpu.memory_space<vmem>>, %arg6: memref<8x128xf32, #tpu.memory_space<vmem>>, %arg7: memref<8x128xf32, #tpu.memory_space<vmem>>) attributes {dimension_semantics = [#tpu.dimension_semantics<parallel>, #tpu.dimension_semantics<parallel>, #tpu.dimension_semantics<arbitrary>], iteration_bounds = array<i64: 1, 1, 1>, scalar_prefetch = 0 : i64, scratch_operands = 1 : i64, tpu.core_type = #tpu.core_type<tc>, window_params = [{transform_indices = @transform_0, window_bounds = array<i64: 8, 128>}, {transform_indices = @transform_1, window_bounds = array<i64: 128, 128>}, {transform_indices = @transform_2, window_bounds = array<i64: 1, 128>}, {transform_indices = @transform_3, window_bounds = array<i64: 8, 128>}]} {
    %c0_i32 = arith.constant 0 : i32
    %0 = arith.cmpi eq, %arg2, %c0_i32 : i32
    %1 = arith.extui %0 : i1 to i32
    %c0_i32_0 = arith.constant 0 : i32
    %2 = arith.cmpi ne, %1, %c0_i32_0 : i32
    scf.if %2 {
      %c0_10 = arith.constant 0 : index
      %c0_11 = arith.constant 0 : index
      %12 = vector.load %arg5[%c0_10, %c0_11] : memref<1x128xf32, #tpu.memory_space<vmem>>, vector<1x128xf32>
      %13 = vector.shape_cast %12 : vector<1x128xf32> to vector<1x128xf32>
      %14 = vector.broadcast %13 : vector<1x128xf32> to vector<8x128xf32>
      %c0_12 = arith.constant 0 : index
      %c0_13 = arith.constant 0 : index
      %15 = vector.load %arg7[%c0_12, %c0_13] : memref<8x128xf32, #tpu.memory_space<vmem>>, vector<8x128xf32>
      tpu.vector_store %arg7[%c0_12, %c0_13], %14 {strides = array<i32>} : memref<8x128xf32, #tpu.memory_space<vmem>>, vector<8x128xf32>,
    } else {
    }
    %c0 = arith.constant 0 : index
    %c0_1 = arith.constant 0 : index
    %3 = vector.load %arg7[%c0, %c0_1] : memref<8x128xf32, #tpu.memory_space<vmem>>, vector<8x128xf32>
    %c0_2 = arith.constant 0 : index
    %c0_3 = arith.constant 0 : index
    %4 = vector.load %arg3[%c0_2, %c0_3] : memref<8x128xf32, #tpu.memory_space<vmem>>, vector<8x128xf32>
    %c0_4 = arith.constant 0 : index
    %c0_5 = arith.constant 0 : index
    %5 = vector.load %arg4[%c0_4, %c0_5] : memref<128x128xf32, #tpu.memory_space<vmem>>, vector<128x128xf32>
    %cst = arith.constant dense<0.000000e+00> : vector<8x128xf32>
    %6 = tpu.matmul %4, %5, %cst {dimension_numbers = #tpu.dot_dimension_numbers<[1], [0], [0], [1], [0, 0, 1, 1], [], []>} : vector<8x128xf32>, vector<128x128xf32>, vector<8x128xf32> -> vector<8x128xf32>
    %7 = arith.addf %3, %6 : vector<8x128xf32>
    %c0_6 = arith.constant 0 : index
    %c0_7 = arith.constant 0 : index
    %8 = vector.load %arg7[%c0_6, %c0_7] : memref<8x128xf32, #tpu.memory_space<vmem>>, vector<8x128xf32>
    tpu.vector_store %arg7[%c0_6, %c0_7], %7 {strides = array<i32>} : memref<8x128xf32, #tpu.memory_space<vmem>>, vector<8x128xf32>,
    %c0_i32_8 = arith.constant 0 : i32
    %9 = arith.cmpi eq, %arg2, %c0_i32_8 : i32
    %10 = arith.extui %9 : i1 to i32
    %c0_i32_9 = arith.constant 0 : i32
    %11 = arith.cmpi ne, %10, %c0_i32_9 : i32
    scf.if %11 {
      %c0_10 = arith.constant 0 : index
      %c0_11 = arith.constant 0 : index
      %12 = vector.load %arg7[%c0_10, %c0_11] : memref<8x128xf32, #tpu.memory_space<vmem>>, vector<8x128xf32>
      %c0_12 = arith.constant 0 : index
      %c0_13 = arith.constant 0 : index
      %13 = vector.load %arg6[%c0_12, %c0_13] : memref<8x128xf32, #tpu.memory_space<vmem>>, vector<8x128xf32>
      tpu.vector_store %arg6[%c0_12, %c0_13], %12 {strides = array<i32>} : memref<8x128xf32, #tpu.memory_space<vmem>>, vector<8x128xf32>,
    } else {
    }
    return
  }
  func.func @transform_0(%arg0: i32, %arg1: i32, %arg2: i32) -> (i32, i32) {
    %c0_i32 = arith.constant 0 : i32
    return %arg0, %arg2 : i32, i32
  }
  func.func @transform_1(%arg0: i32, %arg1: i32, %arg2: i32) -> (i32, i32) {
    %c0_i32 = arith.constant 0 : i32
    return %arg2, %arg1 : i32, i32
  }
  func.func @transform_2(%arg0: i32, %arg1: i32, %arg2: i32) -> (i32, i32) {
    %c0_i32 = arith.constant 0 : i32
    %c0_i32_0 = arith.constant 0 : i32
    return %c0_i32, %arg1 : i32, i32
  }
  func.func @transform_3(%arg0: i32, %arg1: i32, %arg2: i32) -> (i32, i32) {
    %c0_i32 = arith.constant 0 : i32
    return %arg0, %arg1 : i32, i32
  }
}

</mosaic_0001>

<bundles_post_ra>
// kernel: tpu_custom_call.1
= control target key start
LH: loop header
LB: loop body
LE: loop exit
PB: predicated region body
PF: predicated region fallthrough
CT: control target
= control target key end

     0   :  { %8 = vsyncpa [#allocation4], 0  ;;  %s395_s0 = inlined_call_operand.hbm [shape: f32[8,128], index: 0, kind: input, shape index: {}]   ;;  %s396_s1 = inlined_call_operand.hbm [shape: f32[128,128], index: 1, kind: input, shape index: {}]   ;;  %s397_s2 = inlined_call_operand.vmem [shape: f32[1,128], index: 2, kind: input, shape index: {}]   ;;  %s398_s3 = inlined_call_operand.hbm [shape: f32[8,128], index: 3, kind: output, shape index: {}]  }
   0x1   :  { %9 = vsyncpa [#allocation7], 0 }
   0x2   :  { %10 = vsyncpa [#allocation5], 0  ;;  %s321_s12 = smov [#allocation3]   ;;  %s322_s14 = smov [#allocation6]  }
   0x3   :  { %s17_s13 = sshll.u32 %s321_s12, 4  ;;  %s26_s15 = sshll.u32 %s322_s14, 4  ;;  %s18_s13 = int_to_ptr.vmem [resolvable:$true] %s17_s13  ;;  %s349_s15 = int_to_ptr.vmem [resolvable:$true] %s26_s15 }
   0x4   :  { %s249_s18 = scalar_lea.hbm %s395_s0, 128 }
   0x5   :  { %p250_p0 = scmp.ne.s32.totalorder %s395_s0, %s249_s18  ;;  %p253_p1 = scmp.lt.u32.totalorder %s249_s18, %s395_s0 }
   0x7   :  { %p255_p2 = pnand %p253_p1, %p250_p0 }
   0x9   :  { %258 = shalt.err (!%p255_p2)
}
   0xa   :  { %s259_s23 = scalar_lea.vmem %s18_s13, 128  ;;  %p264_p4 = scmp.lt.s32.totalorder %s18_s13, %s18_s13 }
   0xb   :  { %p260_p3 = scmp.ne.s32.totalorder %s18_s13, %s259_s23  ;;  %p265_p5 = scmp.lt.s32.totalorder %s259_s23, %s259_s23 }
   0xd   :  { %p266_p6 = por %p265_p5, %p264_p4 }
   0xf   :  { %p267_p7 = pnand %p266_p6, %p260_p3 }
  0x11   :  { %270 = shalt.err (!%p267_p7)
}
  0x12   :  { %20 = dma.hbm_to_vmem [thread:$0]  %s395_s0, 128, %s18_s13, [#allocation4]  }
  0x13   :  { %s271_s28 = scalar_lea.hbm %s396_s1, 2048 }
  0x14   :  { %p272_p8 = scmp.ne.s32.totalorder %s396_s1, %s271_s28  ;;  %p275_p9 = scmp.lt.u32.totalorder %s271_s28, %s396_s1 }
  0x16   :  { %p277_p10 = pnand %p275_p9, %p272_p8 }
  0x18   :  { %280 = shalt.err (!%p277_p10)
}
  0x19   :  { %s281_s6 = scalar_lea.vmem %s349_s15, 2048  ;;  %p286_p12 = scmp.lt.s32.totalorder %s349_s15, %s349_s15 }
  0x1a   :  { %p282_p11 = scmp.ne.s32.totalorder %s349_s15, %s281_s6  ;;  %p287_p13 = scmp.lt.s32.totalorder %s281_s6, %s281_s6 }
  0x1c   :  { %p288_p0 = por %p287_p13, %p286_p12 }
  0x1e   :  { %p289_p1 = pnand %p288_p0, %p282_p11 }
  0x20   :  { %292 = shalt.err (!%p289_p1)
}
  0x21   :  { %s323_s0 = smov 128   ;;  %s324_s7 = smov 8  }
  0x22   :  { %32 = dma.hbm_to_vmem [thread:$0]  %s396_s1, 2048, %s349_s15, [#allocation7], %s323_s0, %s323_s0, %s324_s7  }
  0x23   :  { %315 = dma.done.wait [#allocation4], 128  }
  0x24   :  { %316 = vsyncadd [#allocation4], 4294967168 }
  0x25   :  { %317 = dma.done.wait [#allocation7], 2048  }
  0x26   :  { %318 = vsyncadd [#allocation7], 4294965248  ;;  %v325_v0 = vmov 0.0|0.0   ;;  %vm326_vm0 = vmmov 0   ;;  %v327_v1 = vmov 0.0   ;;  %v55_v2 = vld [vmem:[#allocation6] sm:$0xff] }
  0x27   :  { %217 = vmatprep.subr.bf16.mxu0 %v325_v0  ;;  %214 = vmatprep.mubr.msk.f32.mxu0 %vm326_vm0, %v327_v1  ;;  %v56_v3 = vld [vmem:[#allocation6 + $0x8] sm:$0xff]  ;;  %v57_v4 = vld [vmem:[#allocation6 + $0x10] sm:$0xff]  ;;  %v58_v6 = vld [vmem:[#allocation6 + $0x18] sm:$0xff]  ;;  %s328_s11 = smov [#allocation8]  }
  0x28   :  { %v218_v5 = vpack.c.bf16 %v56_v3, %v55_v2  ;;  %v221_v7 = vpack.c.bf16 %v58_v6, %v57_v4  ;;  %v59_v8 = vld [vmem:[#allocation6 + $0x20] sm:$0xff]  ;;  %v60_v9 = vld [vmem:[#allocation6 + $0x28] sm:$0xff]  ;;  %v61_v11 = vld [vmem:[#allocation6 + $0x30] sm:$0xff]  ;;  %s154_s12 = sshll.u32 %s328_s11, 4  ;;  %s155_s12 = int_to_ptr.vmem [resolvable:$true] %s154_s12 }
  0x29   :  { %v224_v10 = vpack.c.bf16 %v60_v9, %v59_v8  ;;  %v62_v12 = vld [vmem:[#allocation6 + $0x38] sm:$0xff]  ;;  %v63_v14 = vld [vmem:[#allocation6 + $0x40] sm:$0xff]  ;;  %v64_v15 = vld [vmem:[#allocation6 + $0x48] sm:$0xff]  ;;  %s293_s13 = scalar_lea.vmem %s155_s12, 128  ;;  %p298_p3 = scmp.lt.s32.totalorder %s155_s12, %s155_s12 }
  0x2a   :  { %219 = vmatpush3.bf16.msra.mxu0 %v218_v5  ;;  %v227_v13 = vpack.c.bf16 %v62_v12, %v61_v11  ;;  %v230_v16 = vpack.c.bf16 %v64_v15, %v63_v14  ;;  %v65_v17 = vld [vmem:[#allocation6 + $0x50] sm:$0xff]  ;;  %v66_v18 = vld [vmem:[#allocation6 + $0x58] sm:$0xff]  ;;  %v67_v20 = vld [vmem:[#allocation6 + $0x60] sm:$0xff]  ;;  %p294_p2 = scmp.ne.s32.totalorder %s155_s12, %s293_s13  ;;  %p299_p4 = scmp.lt.s32.totalorder %s293_s13, %s293_s13 }
  0x2b   :  { %220 = vmatprep.subr.bf16.mxu0 %v325_v0  ;;  %v233_v19 = vpack.c.bf16 %v66_v18, %v65_v17  ;;  %v68_v21 = vld [vmem:[#allocation6 + $0x68] sm:$0xff]  ;;  %v69_v23 = vld [vmem:[#allocation6 + $0x70] sm:$0xff]  ;;  %v70_v24 = vld [vmem:[#allocation6 + $0x78] sm:$0xff] }
  0x2c   :  { %v236_v22 = vpack.c.bf16 %v68_v21, %v67_v20  ;;  %v239_v25 = vpack.c.bf16 %v70_v24, %v69_v23  ;;  %v54_v26 = vld [vmem:[#allocation3] sm:$0xff]  ;;  %p300_p5 = por %p299_p4, %p298_p3 }
  0x2d   :  { %v164_v27 = vld [vmem:[%s397_s2] ss:$0 sm:$0xff] }
  0x2e   :  { %222 = vmatpush3.bf16.msra.mxu0 %v221_v7  ;;  %p301_p6 = pnand %p300_p5, %p294_p2 }
  0x2f   :  { %223 = vmatprep.subr.bf16.mxu0 %v325_v0 }
  0x32   :  { %225 = vmatpush3.bf16.msra.mxu0 %v224_v10 }
  0x33   :  { %226 = vmatprep.subr.bf16.mxu0 %v325_v0 }
  0x36   :  { %228 = vmatpush3.bf16.msra.mxu0 %v227_v13 }
  0x37   :  { %229 = vmatprep.subr.bf16.mxu0 %v325_v0 }
  0x3a   :  { %231 = vmatpush3.bf16.msra.mxu0 %v230_v16 }
  0x3b   :  { %232 = vmatprep.subr.bf16.mxu0 %v325_v0 }
  0x3e   :  { %234 = vmatpush3.bf16.msra.mxu0 %v233_v19 }
  0x3f   :  { %235 = vmatprep.subr.bf16.mxu0 %v325_v0 }
  0x42   :  { %237 = vmatpush3.bf16.msra.mxu0 %v236_v22 }
  0x43   :  { %238 = vmatprep.subr.bf16.mxu0 %v325_v0 }
  0x46   :  { %240 = vmatpush3.bf16.msra.mxu0 %v239_v25 }
  0x49   :  { %215 = vmatmul.mubr.f32.vlgmr.msra.gmra.mrb[0].mxu0 %v54_v26 }
 0x11c   :  { %v137_v28 = vpop.f32.mrb[0].mxu0 }
 0x11d   :  { %v141_v29 = vadd.f32 %v164_v27, %v137_v28  ;;  %v216_v30 = vpop.f32.mrb[1].mxu0 }
 0x11f   :  { %147 = vst [vmem:[#allocation8] sm:$0xff] %v141_v29 }
 0x120   :  { %304 = shalt.err (!%p301_p6)
}
 0x121   :  { %s305_s16 = scalar_lea.hbm %s398_s3, 128 }
 0x122   :  { %p306_p7 = scmp.ne.s32.totalorder %s398_s3, %s305_s16  ;;  %p309_p8 = scmp.lt.u32.totalorder %s305_s16, %s398_s3 }
 0x124   :  { %p311_p9 = pnand %p309_p8, %p306_p7 }
 0x126   :  { %314 = shalt.err (!%p311_p9)
}
 0x127   :  { %157 = dma.vmem_to_hbm [thread:$0]  %s155_s12, 128, %s398_s3, [#allocation5]  }
 0x128   :  { %319 = dma.done.wait [#allocation5], 128  }
 0x129   :  { %320 = vsyncadd [#allocation5], 4294967168 }
 0x12a   :  { %161 = vsyncpa [#allocation4], 1 }
 0x12b   :  { %162 = vsyncpa [#allocation7], 1 }
 0x12c   :  { %163 = vsyncpa [#allocation5], 1 }

</bundles_post_ra>
